<compile_context>
chip_gen: v5e
topology: v5e:2x2
jax: 0.10.0
libtpu: 0.0.40
codegen_flags: <defaults>
</compile_context>

<pallas_src>
import math

import jax
import jax.numpy as jnp
from jax.experimental import pallas as pl
from jax.experimental.pallas import tpu as pltpu


def _dlinear_block_kernel(x_ref, w_ref, b_ref, o_ref):
    # x_ref: (G, P*T*C)       packed slab-major activations (C = 2*D)
    # w_ref: (P*T*C, P*T*D)   block-diagonal folded (decomp + time Linear + 1x1 conv) weight
    # b_ref: (1, P*T*D)       folded bias (f32)
    # o_ref: (G, P*T*D)
    acc = jnp.dot(x_ref[...], w_ref[...], preferred_element_type=jnp.float32)
    o_ref[...] = (acc + b_ref[...]).astype(o_ref.dtype)


def _tensorcores_per_device():
    """Best-effort TensorCores per JAX device (v7x / v4 / v5p megacore -> 2, else 1)."""
    try:
        kind = jax.devices()[0].device_kind.lower()
    except Exception:
        return 1
    if "v7" in kind or "v4" in kind or "v5p" in kind:
        return 2
    return 1


def _choose_pack(T, D, BN):
    """Slabs packed per row: smallest P making (P*T*D) a multiple of 128 (capped at 8),
    reduced to a power of two that divides B*N so the packing reshape is free (no pad)."""
    p = min(128 // math.gcd(128, T * D), 8)
    while p > 1 and BN % p:
        p //= 2
    return p


def _choose_block_rows(rows, in_row_bytes, out_row_bytes, cores):
    """Rows per grid step: ~8 MiB input blocks, <=24 MiB of double-buffered activation
    blocks, split across TensorCores only when the chip actually has more than one."""
    if rows <= 8:
        return rows
    budget = 24 << 20                                   # 2 * (in + out) block buffers
    g = budget // (2 * (in_row_bytes + out_row_bytes))
    g = min(g, (8 << 20) // max(in_row_bytes, 1))       # cap input block at ~8 MiB
    g = max(g, 8)
    if cores > 1 and rows >= cores * 8:
        nb = max(-(-rows // g), cores)
        nb = -(-nb // cores) * cores                    # block count a multiple of core count
        g = -(-rows // nb)
    if g >= rows:
        return rows                                     # single block == full array dim
    return -(-g // 8) * 8                               # sublane-aligned; tail block is masked


def dlinear_forward(x, ws, bs, wt, bt, wc, bc, *, block_rows=None):
    """x: (B, N, T, C) with C = 2*D.  wc: (D, C) == Conv2d(2D->D, 1x1).weight[:, :, 0, 0]."""
    B, N, T, C = x.shape
    D = wc.shape[0]
    BN = B * N
    f32 = jnp.float32

    # ---- host-side weight folding (kept in f32 for accuracy) ---------------------------
    idx = jnp.arange(T)
    A = (jnp.abs(idx[:, None] - idx[None, :]) <= 1).astype(f32) / 3.0
    A = A.at[0, 0].add(1.0 / 3.0)          # replicate padding at the front
    A = A.at[T - 1, T - 1].add(1.0 / 3.0)  # replicate padding at the back
    eye_t = jnp.eye(T, dtype=f32)
    w_time = ws.astype(f32) @ (eye_t - A) + wt.astype(f32) @ A          # (T, T)
    b_time = (bs + bt).astype(f32)                                      # (T,)

    wc_t = wc.astype(f32).T                                             # (C, D)
    # W_big[t*C + c, u*D + d] = W_time[u, t] * WcT[c, d]
    w_big = jnp.einsum("ut,cd->tcud", w_time, wc_t).reshape(T * C, T * D)
    b_big = (b_time[:, None] * jnp.sum(wc_t, axis=0)[None, :]
             + bc.astype(f32)[None, :]).reshape(1, T * D)

    # ---- pack P slabs per row (lane-dense output) via a block-diagonal weight ----------
    P = _choose_pack(T, D, BN)
    if P > 1:
        eye_p = jnp.eye(P, dtype=f32)
        w_big = jnp.einsum("pq,km->pkqm", eye_p, w_big).reshape(P * T * C, P * T * D)
        b_big = jnp.tile(b_big, (1, P))

    # Feed the MXU in the activation dtype (bf16 stays bf16; no blanket f32 upcast).
    if x.dtype != f32:
        w_big = w_big.astype(x.dtype)

    rows = BN // P
    K = P * T * C
    Nw = P * T * D
    x2 = x.reshape(rows, K)                 # free, contiguous reshape — no pad, no copy
    out_dtype = x.dtype

    # ---- blocking -----------------------------------------------------------------------
    in_row_bytes = K * x2.dtype.itemsize
    out_row_bytes = Nw * jnp.dtype(out_dtype).itemsize
    if block_rows is not None:
        G = min(max(int(block_rows), 1), rows)
        if G < rows:
            G = max(8, (G // 8) * 8)        # sublane alignment when not a full block
    else:
        G = _choose_block_rows(rows, in_row_bytes, out_row_bytes, _tensorcores_per_device())
    num_blocks = -(-rows // G)              # ragged tail handled by Pallas boundary masking

    out = pl.pallas_call(
        _dlinear_block_kernel,
        out_shape=jax.ShapeDtypeStruct((rows, Nw), out_dtype),
        grid=(num_blocks,),
        in_specs=[
            pl.BlockSpec((G, K), lambda i: (i, 0)),
            pl.BlockSpec((K, Nw), lambda i: (0, 0)),   # constant index_map -> fetched once
            pl.BlockSpec((1, Nw), lambda i: (0, 0)),   # constant index_map -> fetched once
        ],
        out_specs=pl.BlockSpec((G, Nw), lambda i: (i, 0)),
        compiler_params=pltpu.CompilerParams(
            dimension_semantics=("parallel",),
            # explicit 32 MiB: v5e's scoped default is only 16 MiB; blocks sized to <=~25 MiB
            vmem_limit_bytes=32 * 1024 * 1024,
        ),
    )(x2, w_big, b_big)

    return out.reshape(B, N, T, D)


def dlinear_reference(x, ws, bs, wt, bt, wc, bc):
    """Pure-JAX reference matching the PyTorch DLinear forward semantics."""
    B, N, T, C = x.shape
    xr = x.reshape(B * N, T, C).astype(jnp.float32)
    prev = jnp.concatenate([xr[:, :1], xr[:, :-1]], axis=1)
    nxt = jnp.concatenate([xr[:, 1:], xr[:, -1:]], axis=1)
    trend = (prev + xr + nxt) / 3.0
    seasonal = xr - trend
    s_out = jnp.einsum("btc,ut->buc", seasonal, ws) + bs[None, :, None]
    t_out = jnp.einsum("btc,ut->buc", trend, wt) + bt[None, :, None]
    out = s_out + t_out                                    # (BN, T, C)
    final = jnp.einsum("btc,dc->btd", out, wc) + bc[None, None, :]
    return final.reshape(B, N, T, -1)


if __name__ == "__main__":
    # Small shapes consistent with the module: x is (B, N, T, 2D).
    B, N, T, D = 2, 20, 8, 4
    C = 2 * D

    key = jax.random.PRNGKey(0)
    kx, k1, k2, k3, k4, k5, k6 = jax.random.split(key, 7)

    x = jax.random.normal(kx, (B, N, T, C), dtype=jnp.float32)

    ws = jax.random.uniform(k1, (T, T), jnp.float32, -0.3, 0.3)   # Seasonal_Linear.weight
    bs = jax.random.uniform(k2, (T,), jnp.float32, -0.3, 0.3)     # Seasonal_Linear.bias
    wt = jax.random.uniform(k3, (T, T), jnp.float32, -0.3, 0.3)   # Trend_Linear.weight
    bt = jax.random.uniform(k4, (T,), jnp.float32, -0.3, 0.3)     # Trend_Linear.bias
    wc = jax.random.uniform(k5, (D, C), jnp.float32, -0.3, 0.3)   # Conv2d(2D->D,1x1).weight[:,:,0,0]
    bc = jax.random.uniform(k6, (D,), jnp.float32, -0.3, 0.3)     # Conv2d bias

    ref = dlinear_reference(x, ws, bs, wt, bt, wc, bc)

    # 1) default blocking (tiny shapes -> single full block, P=4 packing -> 128-lane output)
    out = jax.block_until_ready(dlinear_forward(x, ws, bs, wt, bt, wc, bc))
    assert out.shape == (B, N, T, D), out.shape
    err = float(jnp.max(jnp.abs(out - ref)))
    assert jnp.allclose(out, ref, atol=2e-4, rtol=2e-4), err

    # 2) forced small blocks: exercises the ragged-tail (boundary-block masking) path
    #    with no host-side padding (rows=10, block=8 -> grid of 2, last block masked).
    out2 = jax.block_until_ready(dlinear_forward(x, ws, bs, wt, bt, wc, bc, block_rows=8))
    err2 = float(jnp.max(jnp.abs(out2 - ref)))
    assert jnp.allclose(out2, ref, atol=2e-4, rtol=2e-4), err2

    print("KERNEL_OK")
</pallas_src>

<mosaic_0001>
module attributes {stable_mosaic.version = 11 : i64} {
  func.func @_dlinear_block_kernel(%arg0: i32, %arg1: memref<10x256xf32, #tpu.memory_space<vmem>>, %arg2: memref<256x128xf32, #tpu.memory_space<vmem>>, %arg3: memref<1x128xf32, #tpu.memory_space<vmem>>, %arg4: memref<10x128xf32, #tpu.memory_space<vmem>>) attributes {dimension_semantics = [#tpu.dimension_semantics<parallel>], iteration_bounds = array<i64: 1>, scalar_prefetch = 0 : i64, scratch_operands = 0 : i64, tpu.core_type = #tpu.core_type<tc>, window_params = [{transform_indices = @transform_0, window_bounds = array<i64: 10, 256>}, {pipeline_mode = #tpu.pipeline_mode<synchronous>, transform_indices = @transform_1, window_bounds = array<i64: 256, 128>}, {pipeline_mode = #tpu.pipeline_mode<synchronous>, transform_indices = @transform_2, window_bounds = array<i64: 1, 128>}, {transform_indices = @transform_3, window_bounds = array<i64: 10, 128>}]} {
    %c0 = arith.constant 0 : index
    %c0_0 = arith.constant 0 : index
    %0 = vector.load %arg1[%c0, %c0_0] : memref<10x256xf32, #tpu.memory_space<vmem>>, vector<10x256xf32>
    %c0_1 = arith.constant 0 : index
    %c0_2 = arith.constant 0 : index
    %1 = vector.load %arg2[%c0_1, %c0_2] : memref<256x128xf32, #tpu.memory_space<vmem>>, vector<256x128xf32>
    %cst = arith.constant dense<0.000000e+00> : vector<10x128xf32>
    %2 = tpu.matmul %0, %1, %cst {dimension_numbers = #tpu.dot_dimension_numbers<[1], [0], [0], [1], [0, 0, 1, 1], [], []>} : vector<10x256xf32>, vector<256x128xf32>, vector<10x128xf32> -> vector<10x128xf32>
    %c0_3 = arith.constant 0 : index
    %c0_4 = arith.constant 0 : index
    %3 = vector.load %arg3[%c0_3, %c0_4] : memref<1x128xf32, #tpu.memory_space<vmem>>, vector<1x128xf32>
    %4 = vector.broadcast %3 : vector<1x128xf32> to vector<10x128xf32>
    %5 = arith.addf %2, %4 : vector<10x128xf32>
    %c0_5 = arith.constant 0 : index
    %c0_6 = arith.constant 0 : index
    %6 = vector.load %arg4[%c0_5, %c0_6] : memref<10x128xf32, #tpu.memory_space<vmem>>, vector<10x128xf32>
    tpu.vector_store %arg4[%c0_5, %c0_6], %5 {strides = array<i32>} : memref<10x128xf32, #tpu.memory_space<vmem>>, vector<10x128xf32>,
    return
  }
  func.func @transform_0(%arg0: i32) -> (i32, i32) {
    %c0_i32 = arith.constant 0 : i32
    %c0_i32_0 = arith.constant 0 : i32
    return %arg0, %c0_i32 : i32, i32
  }
  func.func @transform_1(%arg0: i32) -> (i32, i32) {
    %c0_i32 = arith.constant 0 : i32
    %c0_i32_0 = arith.constant 0 : i32
    %c0_i32_1 = arith.constant 0 : i32
    return %c0_i32, %c0_i32_0 : i32, i32
  }
  func.func @transform_2(%arg0: i32) -> (i32, i32) {
    %c0_i32 = arith.constant 0 : i32
    %c0_i32_0 = arith.constant 0 : i32
    %c0_i32_1 = arith.constant 0 : i32
    return %c0_i32, %c0_i32_0 : i32, i32
  }
  func.func @transform_3(%arg0: i32) -> (i32, i32) {
    %c0_i32 = arith.constant 0 : i32
    %c0_i32_0 = arith.constant 0 : i32
    return %arg0, %c0_i32 : i32, i32
  }
}

</mosaic_0001>

<bundles_post_ra>
// kernel: tpu_custom_call.1
= control target key start
LH: loop header
LB: loop body
LE: loop exit
PB: predicated region body
PF: predicated region fallthrough
CT: control target
= control target key end

     0   :  { %8 = vsyncpa [#allocation3], 0  ;;  %s318_s0 = inlined_call_operand.hbm [shape: f32[10,256], index: 0, kind: input, shape index: {}]   ;;  %s319_s1 = inlined_call_operand.hbm [shape: f32[256,128], index: 1, kind: input, shape index: {}]   ;;  %s320_s2 = inlined_call_operand.vmem [shape: f32[1,128], index: 2, kind: input, shape index: {}]   ;;  %s321_s3 = inlined_call_operand.hbm [shape: f32[10,128], index: 3, kind: output, shape index: {}]  }
   0x1   :  { %9 = vsyncpa [#allocation6], 0 }
   0x2   :  { %10 = vsyncpa [#allocation4], 0  ;;  %s15_s14 = sshll.u32 %s318_s0, 4  ;;  %s273_s15 = smov [#allocation2]   ;;  %s16_s14 = int_to_ptr.hbm [resolvable:$true] %s15_s14 }
   0x3   :  { %s17_s16 = sshll.u32 %s273_s15, 4  ;;  %s28_s19 = sshll.u32 %s319_s1, 4  ;;  %s18_s16 = int_to_ptr.vmem [resolvable:$true] %s17_s16  ;;  %s29_s19 = int_to_ptr.hbm [resolvable:$true] %s28_s19 }
   0x4   :  { %s274_s20 = smov 256   ;;  %s275_s21 = smov 16  }
   0x5   :  { %23 = dma.hbm_to_vmem [thread:$0]  %s16_s14, 512, %s18_s16, [#allocation3], %s274_s20, %s274_s20, %s275_s21  }
   0x6   :  { %s276_s22 = smov [#allocation5]   ;;  %s277_s24 = smov 128  }
   0x7   :  { %s30_s23 = sshll.u32 %s276_s22, 4  ;;  %s278_s25 = smov 8   ;;  %s31_s23 = int_to_ptr.vmem [resolvable:$true] %s30_s23 }
   0x8   :  { %36 = dma.hbm_to_vmem [thread:$0]  %s29_s19, 4096, %s31_s23, [#allocation6], %s277_s24, %s277_s24, %s278_s25  }
   0x9   :  { %267 = dma.done.wait [#allocation3], 512  }
   0xa   :  { %268 = vsyncadd [#allocation3], 4294966784 }
   0xb   :  { %269 = dma.done.wait [#allocation6], 4096  }
   0xc   :  { %270 = vsyncadd [#allocation6], 4294963200  ;;  %v66_v0 = vld [vmem:[#allocation5 + $0x78] sm:$0xff]  ;;  %v65_v1 = vld [vmem:[#allocation5 + $0x70] sm:$0xff]  ;;  %s279_s26 = smov [#allocation7]   ;;  %s141_s30 = sshll.u32 %s321_s3, 4  ;;  %s142_s30 = int_to_ptr.hbm [resolvable:$true] %s141_s30 }
   0xd   :  { %v82_v2 = vld [vmem:[#allocation5 + $0xf8] sm:$0xff]  ;;  %155 = vmatpush.msra.mxu2 %v66_v0  ;;  %v81_v3 = vld [vmem:[#allocation5 + $0xf0] sm:$0xff]  ;;  %v64_v4 = vld [vmem:[#allocation5 + $0x68] sm:$0xff]  ;;  %87 = vmatpush.msra.mxu0 %v66_v0  ;;  %s139_s27 = sshll.u32 %s279_s26, 4  ;;  %s140_s27 = int_to_ptr.vmem [resolvable:$true] %s139_s27 }
   0xe   :  { %171 = vmatpush.msra.mxu3 %v82_v2  ;;  %v80_v5 = vld [vmem:[#allocation5 + $0xe8] sm:$0xff]  ;;  %110 = vmatpush.msra.mxu1 %v82_v2  ;;  %v63_v6 = vld [vmem:[#allocation5 + $0x60] sm:$0xff]  ;;  %v62_v8 = vld [vmem:[#allocation5 + $0x58] sm:$0xff] }
   0xf   :  { %156 = vmatpush.msra.mxu2 %v65_v1  ;;  %88 = vmatpush.msra.mxu0 %v65_v1  ;;  %v79_v7 = vld [vmem:[#allocation5 + $0xe0] sm:$0xff]  ;;  %v78_v9 = vld [vmem:[#allocation5 + $0xd8] sm:$0xff]  ;;  %v61_v10 = vld [vmem:[#allocation5 + $0x50] sm:$0xff] }
  0x10   :  { %172 = vmatpush.msra.mxu3 %v81_v3  ;;  %111 = vmatpush.msra.mxu1 %v81_v3  ;;  %v77_v11 = vld [vmem:[#allocation5 + $0xd0] sm:$0xff]  ;;  %v60_v12 = vld [vmem:[#allocation5 + $0x48] sm:$0xff]  ;;  %v59_v14 = vld [vmem:[#allocation5 + $0x40] sm:$0xff] }
  0x11   :  { %157 = vmatpush.msra.mxu2 %v64_v4  ;;  %89 = vmatpush.msra.mxu0 %v64_v4  ;;  %v76_v13 = vld [vmem:[#allocation5 + $0xc8] sm:$0xff]  ;;  %v75_v15 = vld [vmem:[#allocation5 + $0xc0] sm:$0xff]  ;;  %v58_v16 = vld [vmem:[#allocation5 + $0x38] sm:$0xff] }
  0x12   :  { %173 = vmatpush.msra.mxu3 %v80_v5  ;;  %112 = vmatpush.msra.mxu1 %v80_v5  ;;  %v74_v17 = vld [vmem:[#allocation5 + $0xb8] sm:$0xff]  ;;  %v57_v18 = vld [vmem:[#allocation5 + $0x30] sm:$0xff]  ;;  %v56_v20 = vld [vmem:[#allocation5 + $0x28] sm:$0xff] }
  0x13   :  { %158 = vmatpush.msra.mxu2 %v63_v6  ;;  %90 = vmatpush.msra.mxu0 %v63_v6  ;;  %v73_v19 = vld [vmem:[#allocation5 + $0xb0] sm:$0xff]  ;;  %v72_v21 = vld [vmem:[#allocation5 + $0xa8] sm:$0xff]  ;;  %v55_v22 = vld [vmem:[#allocation5 + $0x20] sm:$0xff] }
  0x14   :  { %174 = vmatpush.msra.mxu3 %v79_v7  ;;  %113 = vmatpush.msra.mxu1 %v79_v7  ;;  %v71_v23 = vld [vmem:[#allocation5 + $0xa0] sm:$0xff]  ;;  %v54_v24 = vld [vmem:[#allocation5 + $0x18] sm:$0xff]  ;;  %v53_v26 = vld [vmem:[#allocation5 + $0x10] sm:$0xff] }
  0x15   :  { %159 = vmatpush.msra.mxu2 %v62_v8  ;;  %91 = vmatpush.msra.mxu0 %v62_v8  ;;  %v70_v25 = vld [vmem:[#allocation5 + $0x98] sm:$0xff]  ;;  %v69_v27 = vld [vmem:[#allocation5 + $0x90] sm:$0xff]  ;;  %v52_v28 = vld [vmem:[#allocation5 + $0x8] sm:$0xff] }
  0x16   :  { %175 = vmatpush.msra.mxu3 %v78_v9  ;;  %114 = vmatpush.msra.mxu1 %v78_v9  ;;  %v68_v29 = vld [vmem:[#allocation5 + $0x88] sm:$0xff]  ;;  %v51_v30 = vld [vmem:[#allocation5] sm:$0xff]  ;;  %v49_v32 = vld [vmem:[#allocation2 + $0x10] sm:$0x3] }
  0x17   :  { %160 = vmatpush.msra.mxu2 %v61_v10  ;;  %92 = vmatpush.msra.mxu0 %v61_v10  ;;  %v67_v31 = vld [vmem:[#allocation5 + $0x80] sm:$0xff]  ;;  %v50_v33 = vld [vmem:[#allocation2 + $0x18] sm:$0x3]  ;;  %v48_v35 = vld [vmem:[#allocation2 + $0x8] sm:$0xff] }
  0x18   :  { %176 = vmatpush.msra.mxu3 %v77_v11  ;;  %115 = vmatpush.msra.mxu1 %v77_v11  ;;  %v47_v34 = vld [vmem:[#allocation2] sm:$0xff] }
  0x19   :  { %161 = vmatpush.msra.mxu2 %v60_v12  ;;  %93 = vmatpush.msra.mxu0 %v60_v12  ;;  %v194_v36 = vld [vmem:[%s320_s2] ss:$0 sm:$0xff] }
  0x1a   :  { %177 = vmatpush.msra.mxu3 %v76_v13  ;;  %116 = vmatpush.msra.mxu1 %v76_v13 }
  0x1b   :  { %162 = vmatpush.msra.mxu2 %v59_v14  ;;  %94 = vmatpush.msra.mxu0 %v59_v14 }
  0x1c   :  { %178 = vmatpush.msra.mxu3 %v75_v15  ;;  %117 = vmatpush.msra.mxu1 %v75_v15 }
  0x1d   :  { %163 = vmatpush.msra.mxu2 %v58_v16  ;;  %95 = vmatpush.msra.mxu0 %v58_v16 }
  0x1e   :  { %179 = vmatpush.msra.mxu3 %v74_v17  ;;  %118 = vmatpush.msra.mxu1 %v74_v17 }
  0x1f   :  { %164 = vmatpush.msra.mxu2 %v57_v18  ;;  %96 = vmatpush.msra.mxu0 %v57_v18 }
  0x20   :  { %180 = vmatpush.msra.mxu3 %v73_v19  ;;  %119 = vmatpush.msra.mxu1 %v73_v19 }
  0x21   :  { %165 = vmatpush.msra.mxu2 %v56_v20  ;;  %97 = vmatpush.msra.mxu0 %v56_v20 }
  0x22   :  { %181 = vmatpush.msra.mxu3 %v72_v21  ;;  %120 = vmatpush.msra.mxu1 %v72_v21 }
  0x23   :  { %166 = vmatpush.msra.mxu2 %v55_v22  ;;  %98 = vmatpush.msra.mxu0 %v55_v22 }
  0x24   :  { %182 = vmatpush.msra.mxu3 %v71_v23  ;;  %121 = vmatpush.msra.mxu1 %v71_v23 }
  0x25   :  { %167 = vmatpush.msra.mxu2 %v54_v24  ;;  %99 = vmatpush.msra.mxu0 %v54_v24 }
  0x26   :  { %183 = vmatpush.msra.mxu3 %v70_v25  ;;  %122 = vmatpush.msra.mxu1 %v70_v25 }
  0x27   :  { %168 = vmatpush.msra.mxu2 %v53_v26  ;;  %100 = vmatpush.msra.mxu0 %v53_v26 }
  0x28   :  { %184 = vmatpush.msra.mxu3 %v69_v27  ;;  %123 = vmatpush.msra.mxu1 %v69_v27 }
  0x29   :  { %169 = vmatpush.msra.mxu2 %v52_v28  ;;  %101 = vmatpush.msra.mxu0 %v52_v28 }
  0x2a   :  { %185 = vmatpush.msra.mxu3 %v68_v29  ;;  %124 = vmatpush.msra.mxu1 %v68_v29 }
  0x2b   :  { %170 = vmatpush.msra.mxu2 %v51_v30  ;;  %102 = vmatpush.msra.mxu0 %v51_v30 }
  0x2c   :  { %186 = vmatpush.msra.mxu3 %v67_v31  ;;  %106 = vmatmul.f32.vlgmr.msra.gmra.mxu2 %v49_v32 }
  0x2d   :  { %129 = vmatmul.f32.vlgmr.msra.gmra.mxu3 %v50_v33  ;;  %125 = vmatpush.msra.mxu1 %v67_v31 }
  0x2e   :  { %103 = vmatmul.f32.vlgmr.msra.gmra.mxu0 %v47_v34  ;;  %126 = vmatmul.f32.vlgmr.msra.gmra.mxu1 %v48_v35 }
  0xab   :  { %v104_v37 = vpop.f32.mrf.mxu0  ;;  %v127_v38 = vpop.f32.mrf.mxu1 }
  0xac   :  { %v105_v39 = vadd.f32 %v194_v36, %v104_v37 }
  0xae   :  { %v128_v40 = vadd.f32 %v127_v38, %v105_v39 }
  0xaf   :  { %v107_v41 = vpop.f32.mrf.mxu2 }
  0xb0   :  { %v130_v42 = vpop.f32.mrf.mxu3  ;;  %v108_v43 = vadd.f32 %v194_v36, %v107_v41  ;;  %133 = vst [vmem:[#allocation7] sm:$0xff] %v128_v40 }
  0xb2   :  { %v131_v44 = vadd.f32 %v130_v42, %v108_v43 }
  0xb4   :  { %134 = vst [vmem:[#allocation7 + $0x8] sm:$0x3] %v131_v44 }
  0xb5   :  { %147 = dma.vmem_to_hbm [thread:$0]  %s140_s27, 256, %s142_s30, [#allocation4], %s277_s24, %s277_s24, %s278_s25  }
  0xb6   :  { %271 = dma.done.wait [#allocation4], 256  }
  0xb7   :  { %272 = vsyncadd [#allocation4], 4294967040 }
  0xb8   :  { %152 = vsyncpa [#allocation3], 1 }
  0xb9   :  { %153 = vsyncpa [#allocation6], 1 }
  0xba   :  { %154 = vsyncpa [#allocation4], 1 }

</bundles_post_ra>
